<compile_context>
chip_gen: v5e
topology: v5e:2x2
jax: 0.10.0
libtpu: 0.0.40
codegen_flags: <defaults>
</compile_context>

<pallas_src>
import functools
import math

import jax
import jax.numpy as jnp
from jax import lax
from jax.experimental import pallas as pl
from jax.experimental.pallas import tpu as pltpu


def _cdiv(a, b):
    return (a + b - 1) // b


def _round_up(x, m):
    return _cdiv(x, m) * m


def _pow2_floor(x):
    return 1 << (int(x).bit_length() - 1)


# ---------------------------------------------------------------------------
# Path 1: HBM-resident table, manual row-gather DMAs landing in out_ref.
# ---------------------------------------------------------------------------
def _embedding_hbm_gather_kernel(tok_ref, emb_hbm, out_ref, sems, *,
                                 scale, tb, n_sem, n_tok, guard_tail):
    """Gather `tb` embedding rows straight into the output block via DMA.

    tok_ref : (n_pad,) int32 in SMEM (scalar-prefetched token ids)
    emb_hbm : (V, D) table left in HBM (memory_space=pl.ANY)
    out_ref : (tb, D) output block in VMEM -- DMAs land here directly
    sems    : (n_sem,) DMA semaphores (ring -> n_sem row copies in flight)
    """
    blk = pl.program_id(0)
    base = blk * tb
    slot_mask = n_sem - 1            # n_sem is a power of two -> AND, not modulo

    def start_row(t, tok):
        pltpu.make_async_copy(
            emb_hbm.at[pl.ds(tok, 1), :],      # one (1, D) row in HBM
            out_ref.at[pl.ds(t, 1), :],        # row t of the output block
            sems.at[t & slot_mask],
        ).start()

    def wait_row(t):
        # Wait descriptor: only transfer shape/bytes + semaphore matter; the
        # HBM source row is irrelevant (same idiom as the paged-attention kernel).
        pltpu.make_async_copy(
            emb_hbm.at[pl.ds(0, 1), :],
            out_ref.at[pl.ds(t, 1), :],
            sems.at[t & slot_mask],
        ).wait()

    def maybe(cond, fn):
        # Tail guard is only compiled in when the last block has padded rows;
        # exactly-divisible inputs pay zero per-row branch cost.
        if guard_tail:
            pl.when(cond)(fn)
        else:
            fn()

    def prime(t, _):
        tok = tok_ref[base + t]
        maybe(base + t < n_tok, lambda: start_row(t, tok))
        return None

    def steady(t, _):
        # SMEM scalar read BEFORE the wait: .wait() breaks sst->sld forwarding,
        # so hoisting the token-id load avoids a per-row scalar stall.
        tok = tok_ref[base + t]
        maybe(base + (t - n_sem) < n_tok, lambda: wait_row(t - n_sem))
        maybe(base + t < n_tok, lambda: start_row(t, tok))
        return None

    def drain(t, _):
        maybe(base + t < n_tok, lambda: wait_row(t))
        return None

    # Prime the ring: n_sem row-gathers in flight.
    lax.fori_loop(0, n_sem, prime, None, unroll=True)
    # Steady state: retire the oldest copy on a slot, reuse the slot.
    if tb > n_sem:
        lax.fori_loop(n_sem, tb, steady, None, unroll=8)
    # Drain remaining in-flight copies.
    lax.fori_loop(tb - n_sem, tb, drain, None, unroll=True)

    # Fused sqrt(D) scaling, in place, single lane-dense pass over the block.
    # (Python-float scale is weakly typed: bf16 tables stay bf16.)
    out_ref[...] = out_ref[...] * scale


# ---------------------------------------------------------------------------
# Path 2: table resident in VMEM -- per-row dynamic vector loads, no DMAs.
# ---------------------------------------------------------------------------
def _embedding_vmem_kernel(tok_ref, emb_ref, out_ref, *, scale, tb):
    """Padded tail ids are 0 (a valid row), so no tail guard needed here --
    gathering a pad row is just a cheap on-chip load."""
    blk = pl.program_id(0)
    base = blk * tb

    def body(t, _):
        tok = tok_ref[base + t]
        out_ref[pl.ds(t, 1), :] = emb_ref[pl.ds(tok, 1), :] * scale
        return None

    lax.fori_loop(0, tb, body, None, unroll=8)


def embedding_forward(tokens, emb_table, *, token_block=256, max_inflight=32,
                      vmem_table_bytes=8 << 20, force_hbm_gather=False):
    """tokens: (B, S) int; emb_table: (V, D) -> (B, S, D) = table[tokens]*sqrt(D)."""
    B, S = tokens.shape
    V, D = emb_table.shape
    n_tok = B * S
    scale = float(math.sqrt(D))
    itemsize = jnp.dtype(emb_table.dtype).itemsize

    assert token_block % 8 == 0 and token_block >= 8
    assert max_inflight >= 1

    # --- token block sizing --------------------------------------------------
    # (a) big enough to amortize the ~0.35 us/grid-step overhead,
    # (b) small enough that there are >=2 grid blocks when possible, so the
    #     "parallel" axis actually splits across v7x's two TensorCores,
    # (c) clamped so the two pipelined (tb, D) output buffers stay well under
    #     the scoped-VMEM limit (v5e default 16 MiB, v7x physical 64 MiB).
    tb = min(token_block, _round_up(max(_cdiv(n_tok, 2), 1), 8))
    max_tb_vmem = max(8, ((8 << 20) // max(2 * D * itemsize, 1)) // 8 * 8)
    tb = max(8, min(tb, max_tb_vmem))

    n_pad = _round_up(n_tok, tb)
    guard_tail = n_pad != n_tok

    # Flat token ids for SMEM scalar prefetch; pad with a valid id (0).
    # TODO(synk): for very long B*S (hundreds of thousands of tokens) chunk the
    # id array across multiple pallas_calls so it does not overflow SMEM.
    tok_flat = tokens.reshape(n_tok).astype(jnp.int32)
    if guard_tail:
        tok_flat = jnp.pad(tok_flat, (0, n_pad - n_tok))

    grid = (n_pad // tb,)
    compiler_params = pltpu.CompilerParams(
        dimension_semantics=("parallel",),       # token blocks are independent
        vmem_limit_bytes=32 << 20,               # > v5e's 16 MiB default scoped
    )
    out_shape = jax.ShapeDtypeStruct((n_pad, D), emb_table.dtype)
    out_spec = pl.BlockSpec((tb, D), lambda i, tok: (i, 0))

    table_bytes = V * D * itemsize
    use_vmem_path = (table_bytes <= vmem_table_bytes) and not force_hbm_gather

    if use_vmem_path:
        out = pl.pallas_call(
            functools.partial(_embedding_vmem_kernel, scale=scale, tb=tb),
            out_shape=out_shape,
            grid_spec=pltpu.PrefetchScalarGridSpec(
                num_scalar_prefetch=1,                      # token ids -> SMEM
                grid=grid,
                in_specs=[pl.BlockSpec((V, D), lambda i, tok: (0, 0))],
                out_specs=out_spec,
            ),
            compiler_params=compiler_params,
        )(tok_flat, emb_table)
    else:
        n_sem = _pow2_floor(min(max_inflight, tb))          # power-of-two ring
        out = pl.pallas_call(
            functools.partial(_embedding_hbm_gather_kernel, scale=scale, tb=tb,
                              n_sem=n_sem, n_tok=n_tok, guard_tail=guard_tail),
            out_shape=out_shape,
            grid_spec=pltpu.PrefetchScalarGridSpec(
                num_scalar_prefetch=1,                      # token ids -> SMEM
                grid=grid,
                in_specs=[pl.BlockSpec(memory_space=pl.ANY)],   # table in HBM
                out_specs=out_spec,
                scratch_shapes=[pltpu.SemaphoreType.DMA((n_sem,))],
            ),
            compiler_params=compiler_params,
        )(tok_flat, emb_table)

    return out[:n_tok].reshape(B, S, D)


if __name__ == "__main__":
    # Small deterministic problem. D=128 keeps the output lane-dense.
    VOCAB, D = 1000, 128
    B, S = 2, 8

    key = jax.random.PRNGKey(0)
    k_emb, k_tok = jax.random.split(key)

    # nn.Embedding default init: weights ~ N(0, 1)
    emb_table = jax.random.normal(k_emb, (VOCAB, D), dtype=jnp.float32)
    tokens = jax.random.randint(k_tok, (B, S), 0, VOCAB, dtype=jnp.int32)

    ref = emb_table[tokens] * math.sqrt(D)

    # VMEM-resident fast path (table = 512 KiB, fits easily).
    out_vmem = jax.block_until_ready(embedding_forward(tokens, emb_table))
    assert out_vmem.shape == (B, S, D), out_vmem.shape
    assert out_vmem.dtype == jnp.float32, out_vmem.dtype
    assert jnp.allclose(out_vmem, ref, atol=1e-5, rtol=1e-5), "vmem path mismatch"

    # HBM DMA-gather path (what large vocabularies use).
    out_hbm = jax.block_until_ready(
        embedding_forward(tokens, emb_table, force_hbm_gather=True))
    assert jnp.allclose(out_hbm, ref, atol=1e-5, rtol=1e-5), "hbm path mismatch"

    # Ragged token count -> exercises the padded-tail guard on the gather path.
    tokens_odd = tokens[:, :7]
    ref_odd = emb_table[tokens_odd] * math.sqrt(D)
    out_odd = jax.block_until_ready(
        embedding_forward(tokens_odd, emb_table, force_hbm_gather=True))
    assert jnp.allclose(out_odd, ref_odd, atol=1e-5, rtol=1e-5), "tail-guard mismatch"

    print("KERNEL_OK")
</pallas_src>

<mosaic_0001>
module attributes {stable_mosaic.version = 11 : i64} {
  func.func @_embedding_vmem_kernel(%arg0: i32, %arg1: memref<16xi32, #tpu.memory_space<smem>>, %arg2: memref<1000x128xf32, #tpu.memory_space<vmem>>, %arg3: memref<8x128xf32, #tpu.memory_space<vmem>>) attributes {dimension_semantics = [#tpu.dimension_semantics<parallel>], iteration_bounds = array<i64: 2>, scalar_prefetch = 1 : i64, scratch_operands = 0 : i64, tpu.core_type = #tpu.core_type<tc>, window_params = [{pipeline_mode = #tpu.pipeline_mode<synchronous>, transform_indices = @transform_0, window_bounds = array<i64: 1000, 128>}, {transform_indices = @transform_1, window_bounds = array<i64: 8, 128>}]} {
    %c8_i32 = arith.constant 8 : i32
    %0 = arith.muli %arg0, %c8_i32 : i32
    %c0_i32 = arith.constant 0 : i32
    %1 = arith.addi %0, %c0_i32 : i32
    %2 = arith.index_cast %1 : i32 to index
    %3 = memref.load %arg1[%2] : memref<16xi32, #tpu.memory_space<smem>>
    %4 = arith.index_cast %3 : i32 to index
    %c0 = arith.constant 0 : index
    %5 = vector.load %arg2[%4, %c0] : memref<1000x128xf32, #tpu.memory_space<vmem>>, vector<1x128xf32>
    %cst = arith.constant 11.3137083 : f32
    %6 = vector.broadcast %cst : f32 to vector<1x128xf32>
    %7 = arith.mulf %5, %6 : vector<1x128xf32>
    %8 = arith.index_cast %c0_i32 : i32 to index
    %c0_0 = arith.constant 0 : index
    %9 = vector.load %arg3[%8, %c0_0] : memref<8x128xf32, #tpu.memory_space<vmem>>, vector<1x128xf32>
    tpu.vector_store %arg3[%8, %c0_0], %7 {strides = array<i32>} : memref<8x128xf32, #tpu.memory_space<vmem>>, vector<1x128xf32>,
    %c1_i32 = arith.constant 1 : i32
    %10 = arith.addi %0, %c1_i32 : i32
    %11 = arith.index_cast %10 : i32 to index
    %12 = memref.load %arg1[%11] : memref<16xi32, #tpu.memory_space<smem>>
    %13 = arith.index_cast %12 : i32 to index
    %c0_1 = arith.constant 0 : index
    %14 = vector.load %arg2[%13, %c0_1] : memref<1000x128xf32, #tpu.memory_space<vmem>>, vector<1x128xf32>
    %cst_2 = arith.constant 11.3137083 : f32
    %15 = vector.broadcast %cst_2 : f32 to vector<1x128xf32>
    %16 = arith.mulf %14, %15 : vector<1x128xf32>
    %17 = arith.index_cast %c1_i32 : i32 to index
    %c0_3 = arith.constant 0 : index
    %18 = vector.load %arg3[%17, %c0_3] : memref<8x128xf32, #tpu.memory_space<vmem>>, vector<1x128xf32>
    tpu.vector_store %arg3[%17, %c0_3], %16 {strides = array<i32>} : memref<8x128xf32, #tpu.memory_space<vmem>>, vector<1x128xf32>,
    %c2_i32 = arith.constant 2 : i32
    %19 = arith.addi %0, %c2_i32 : i32
    %20 = arith.index_cast %19 : i32 to index
    %21 = memref.load %arg1[%20] : memref<16xi32, #tpu.memory_space<smem>>
    %22 = arith.index_cast %21 : i32 to index
    %c0_4 = arith.constant 0 : index
    %23 = vector.load %arg2[%22, %c0_4] : memref<1000x128xf32, #tpu.memory_space<vmem>>, vector<1x128xf32>
    %cst_5 = arith.constant 11.3137083 : f32
    %24 = vector.broadcast %cst_5 : f32 to vector<1x128xf32>
    %25 = arith.mulf %23, %24 : vector<1x128xf32>
    %26 = arith.index_cast %c2_i32 : i32 to index
    %c0_6 = arith.constant 0 : index
    %27 = vector.load %arg3[%26, %c0_6] : memref<8x128xf32, #tpu.memory_space<vmem>>, vector<1x128xf32>
    tpu.vector_store %arg3[%26, %c0_6], %25 {strides = array<i32>} : memref<8x128xf32, #tpu.memory_space<vmem>>, vector<1x128xf32>,
    %c3_i32 = arith.constant 3 : i32
    %28 = arith.addi %0, %c3_i32 : i32
    %29 = arith.index_cast %28 : i32 to index
    %30 = memref.load %arg1[%29] : memref<16xi32, #tpu.memory_space<smem>>
    %31 = arith.index_cast %30 : i32 to index
    %c0_7 = arith.constant 0 : index
    %32 = vector.load %arg2[%31, %c0_7] : memref<1000x128xf32, #tpu.memory_space<vmem>>, vector<1x128xf32>
    %cst_8 = arith.constant 11.3137083 : f32
    %33 = vector.broadcast %cst_8 : f32 to vector<1x128xf32>
    %34 = arith.mulf %32, %33 : vector<1x128xf32>
    %35 = arith.index_cast %c3_i32 : i32 to index
    %c0_9 = arith.constant 0 : index
    %36 = vector.load %arg3[%35, %c0_9] : memref<8x128xf32, #tpu.memory_space<vmem>>, vector<1x128xf32>
    tpu.vector_store %arg3[%35, %c0_9], %34 {strides = array<i32>} : memref<8x128xf32, #tpu.memory_space<vmem>>, vector<1x128xf32>,
    %c4_i32 = arith.constant 4 : i32
    %37 = arith.addi %0, %c4_i32 : i32
    %38 = arith.index_cast %37 : i32 to index
    %39 = memref.load %arg1[%38] : memref<16xi32, #tpu.memory_space<smem>>
    %40 = arith.index_cast %39 : i32 to index
    %c0_10 = arith.constant 0 : index
    %41 = vector.load %arg2[%40, %c0_10] : memref<1000x128xf32, #tpu.memory_space<vmem>>, vector<1x128xf32>
    %cst_11 = arith.constant 11.3137083 : f32
    %42 = vector.broadcast %cst_11 : f32 to vector<1x128xf32>
    %43 = arith.mulf %41, %42 : vector<1x128xf32>
    %44 = arith.index_cast %c4_i32 : i32 to index
    %c0_12 = arith.constant 0 : index
    %45 = vector.load %arg3[%44, %c0_12] : memref<8x128xf32, #tpu.memory_space<vmem>>, vector<1x128xf32>
    tpu.vector_store %arg3[%44, %c0_12], %43 {strides = array<i32>} : memref<8x128xf32, #tpu.memory_space<vmem>>, vector<1x128xf32>,
    %c5_i32 = arith.constant 5 : i32
    %46 = arith.addi %0, %c5_i32 : i32
    %47 = arith.index_cast %46 : i32 to index
    %48 = memref.load %arg1[%47] : memref<16xi32, #tpu.memory_space<smem>>
    %49 = arith.index_cast %48 : i32 to index
    %c0_13 = arith.constant 0 : index
    %50 = vector.load %arg2[%49, %c0_13] : memref<1000x128xf32, #tpu.memory_space<vmem>>, vector<1x128xf32>
    %cst_14 = arith.constant 11.3137083 : f32
    %51 = vector.broadcast %cst_14 : f32 to vector<1x128xf32>
    %52 = arith.mulf %50, %51 : vector<1x128xf32>
    %53 = arith.index_cast %c5_i32 : i32 to index
    %c0_15 = arith.constant 0 : index
    %54 = vector.load %arg3[%53, %c0_15] : memref<8x128xf32, #tpu.memory_space<vmem>>, vector<1x128xf32>
    tpu.vector_store %arg3[%53, %c0_15], %52 {strides = array<i32>} : memref<8x128xf32, #tpu.memory_space<vmem>>, vector<1x128xf32>,
    %c6_i32 = arith.constant 6 : i32
    %55 = arith.addi %0, %c6_i32 : i32
    %56 = arith.index_cast %55 : i32 to index
    %57 = memref.load %arg1[%56] : memref<16xi32, #tpu.memory_space<smem>>
    %58 = arith.index_cast %57 : i32 to index
    %c0_16 = arith.constant 0 : index
    %59 = vector.load %arg2[%58, %c0_16] : memref<1000x128xf32, #tpu.memory_space<vmem>>, vector<1x128xf32>
    %cst_17 = arith.constant 11.3137083 : f32
    %60 = vector.broadcast %cst_17 : f32 to vector<1x128xf32>
    %61 = arith.mulf %59, %60 : vector<1x128xf32>
    %62 = arith.index_cast %c6_i32 : i32 to index
    %c0_18 = arith.constant 0 : index
    %63 = vector.load %arg3[%62, %c0_18] : memref<8x128xf32, #tpu.memory_space<vmem>>, vector<1x128xf32>
    tpu.vector_store %arg3[%62, %c0_18], %61 {strides = array<i32>} : memref<8x128xf32, #tpu.memory_space<vmem>>, vector<1x128xf32>,
    %c7_i32 = arith.constant 7 : i32
    %64 = arith.addi %0, %c7_i32 : i32
    %65 = arith.index_cast %64 : i32 to index
    %66 = memref.load %arg1[%65] : memref<16xi32, #tpu.memory_space<smem>>
    %67 = arith.index_cast %66 : i32 to index
    %c0_19 = arith.constant 0 : index
    %68 = vector.load %arg2[%67, %c0_19] : memref<1000x128xf32, #tpu.memory_space<vmem>>, vector<1x128xf32>
    %cst_20 = arith.constant 11.3137083 : f32
    %69 = vector.broadcast %cst_20 : f32 to vector<1x128xf32>
    %70 = arith.mulf %68, %69 : vector<1x128xf32>
    %71 = arith.index_cast %c7_i32 : i32 to index
    %c0_21 = arith.constant 0 : index
    %72 = vector.load %arg3[%71, %c0_21] : memref<8x128xf32, #tpu.memory_space<vmem>>, vector<1x128xf32>
    tpu.vector_store %arg3[%71, %c0_21], %70 {strides = array<i32>} : memref<8x128xf32, #tpu.memory_space<vmem>>, vector<1x128xf32>,
    %c8_i32_22 = arith.constant 8 : i32
    return
  }
  func.func @transform_0(%arg0: i32, %arg1: memref<16xi32, #tpu.memory_space<smem>>) -> (i32, i32) {
    %c0_i32 = arith.constant 0 : i32
    %c0_i32_0 = arith.constant 0 : i32
    %c0_i32_1 = arith.constant 0 : i32
    return %c0_i32, %c0_i32_0 : i32, i32
  }
  func.func @transform_1(%arg0: i32, %arg1: memref<16xi32, #tpu.memory_space<smem>>) -> (i32, i32) {
    %c0_i32 = arith.constant 0 : i32
    %c0_i32_0 = arith.constant 0 : i32
    return %arg0, %c0_i32 : i32, i32
  }
}

</mosaic_0001>

<bundles_post_ra>
// kernel: tpu_custom_call.1
= control target key start
LH: loop header
LB: loop body
LE: loop exit
PB: predicated region body
PF: predicated region fallthrough
CT: control target
= control target key end

     0   :  { %s428_s12 = smov [#allocation3]   ;;  %s569_s0 = inlined_call_operand.hbm [shape: s32[16], index: 0, kind: input, shape index: {}]   ;;  %s570_s1 = inlined_call_operand.hbm [shape: f32[1000,128], index: 1, kind: input, shape index: {}]   ;;  %s571_s2 = inlined_call_operand.hbm [shape: f32[16,128], index: 2, kind: output, shape index: {}]  }
   0x1   :  { %s8_s11 = sshll.u32 %s569_s0, 4  ;;  %s9_s11 = int_to_ptr.hbm [resolvable:$true] %s8_s11 }
   0x2   :  { %11 = dma.hbm_to_smem %s9_s11, 16, %s428_s12, [#allocation2] }
   0x3   :  { %402 = dma.done.wait [#allocation2], 16 }
   0x4   :  { %403 = vsyncadd [#allocation2], 4294967280 }
   0x5   :  { %14 = sfence }
   0x6   :  { %15 = vsyncpa [#allocation5], 0 }
   0x7   :  { %16 = vsyncpa [#allocation6], 0 }
   0x8   :  { %18 = vsyncpa [#allocation6 + $0x1], 0  ;;  %s450_s13 = smov 0   ;;  %s452_s14 = smov 0  }
   0x9   :  { %s454_s15 = smov 0   ;;  %s456_s16 = smov 0  }
   0xa LB: > { %s471_s0 = sadd.s32 4294967295, %s426_s16   ;;  %s252_s17 = sadd.s32 4294967294, %s426_s16   ;;  %s426_s16 = sphi %s456_s16, %s577_s16   ;;  %s422_s15 = sphi %s454_s15, %s576_s15   ;;  %s418_s14 = sphi %s452_s14, %s575_s14   ;;  %s414_s13 = sphi %s450_s13, %s574_s13  }
   0xb   : > { %s475_s18 = sadd.s32 1, %s426_s16   ;;  %s52_s19 = sadd.s32 1, %s422_s15 }
   0xc   : > { %s49_s20 = ssub.s32 %s426_s16, %s475_s18  ;;  %p62_p0 = scmp.ne.s32.totalorder %s422_s15, %s418_s14 }
   0xd   : > { %p50_p1 = scmp.eq.s32.totalorder %s49_s20, 0  ;;  %p63_p2 = scmp.eq.s32.totalorder %s471_s0, 1 }
   0xe   : > { %p68_p3 = scmp.ne.s32.totalorder %s418_s14, %s414_s13  ;;  %p69_p4 = scmp.eq.s32.totalorder %s252_s17, 1 }
   0xf   : > { %s486_s21 = scalar_select %p50_p1, %s422_s15, %s52_s19  }
  0x10   : > { %p488_p5 = por %p63_p2, %p62_p0  ;;  %p492_p6 = por %p69_p4, %p68_p3 }
  0x11   : > { %p253_p7 = scmp.ge.s32.totalorder %s426_s16, 1  ;;  %p76_p8 = scmp.lt.s32.totalorder %s426_s16, 3 }
  0x12   : > { %p277_p9 = scmp.eq.s32.totalorder %s471_s0, 0  ;;  %s87_s26 = sshll.u32 %s570_s1, 4  ;;  %s88_s26 = int_to_ptr.hbm [resolvable:$true] %s87_s26 }
  0x13   : > { %p77_p10 = pnand %p253_p7, %p76_p8  ;;  %s429_s27 = smov [#allocation4]  }
  0x14   : > { %s89_s28 = sshll.u32 %s429_s27, 4  ;;  %s430_s29 = smov 128   ;;  %s90_s28 = int_to_ptr.vmem [resolvable:$true] %s89_s28 }
  0x15   : > { %p269_p11 = pneg %p77_p10  ;;  %s431_s30 = smov 8  }
  0x16   : > { %105 = sbr.rel (%p77_p10) target bundleno = 58 (0x3a), region = 24 }
  0x17   : > { %p270_p12 = pnand %p277_p9, %p269_p11 }
  0x19   : > { %272 = dma.hbm_to_vmem [thread:$0]  (!%p270_p12), %s88_s26, 16000, %s90_s28, [#allocation5], %s430_s29, %s430_s29, %s431_s30  }
  0x1b   : > { %405 = dma.done.wait (%p277_p9), [#allocation5], 16000  }
  0x1c   : > { %407 = vsyncadd (%p277_p9), [#allocation5], 4294951296  ;;  %s118_s3 = sand.u32 1, %s418_s14   ;;  %s510_s4 = sshll.u32 %s471_s0, 3 }
  0x1d   : > { %s257_s5 = sshll.u32 %s118_s3, 3  ;;  %s122_s6 = sld [smem:[#allocation3 + %s510_s4]] }
  0x1e   : > { %s127_s7 = sadd.s32 1, %s510_s4  ;;  %s133_s8 = sadd.s32 2, %s510_s4 }
  0x1f   : > { %s128_s9 = sld [smem:[#allocation3 + %s127_s7]]  ;;  %s139_s10 = sadd.s32 3, %s510_s4 }
  0x20   : > { %s134_s11 = sld [smem:[#allocation3 + %s133_s8]]  ;;  %s145_s12 = sadd.s32 4, %s510_s4 }
  0x21   : > { %s140_s17 = sld [smem:[#allocation3 + %s139_s10]]  ;;  %s151_s0 = sadd.s32 5, %s510_s4 }
  0x22   : > { %s146_s19 = sld [smem:[#allocation3 + %s145_s12]]  ;;  %s157_s25 = sadd.s32 6, %s510_s4 }
  0x23   : > { %s123_s20 = scalar_lea.vmem [#allocation4], %s122_s6  ;;  %s152_s24 = sld [smem:[#allocation3 + %s151_s0]] }
  0x24   : > { %v124_v0 = vld [vmem:[%s123_s20] sm:$0x1]  ;;  %s158_s26 = sld [smem:[#allocation3 + %s157_s25]]  ;;  %s163_s27 = sadd.s32 7, %s510_s4 }
  0x25   : > { %v125_v1 = vmul.f32 11.313708, %v124_v0  ;;  %s522_s28 = sld [smem:[#allocation3 + %s163_s27]]  ;;  %s524_s29 = scalar_lea.vmem [#allocation7], %s257_s5 }
  0x26   : > { %s129_s30 = scalar_lea.vmem [#allocation4], %s128_s9  ;;  %s135_s6 = scalar_lea.vmem [#allocation4], %s134_s11 }
  0x27   : > { %126 = vst [vmem:[%s524_s29] sm:$0x1] %v125_v1  ;;  %v130_v2 = vld [vmem:[%s129_s30] sm:$0x1]  ;;  %s141_s7 = scalar_lea.vmem [#allocation4], %s140_s17  ;;  %s182_s8 = sshll.u32 %s524_s29, 4  ;;  %s183_s8 = int_to_ptr.vmem [resolvable:$true] %s182_s8 }
  0x28   : > { %v131_v3 = vmul.f32 11.313708, %v130_v2  ;;  %v136_v4 = vld [vmem:[%s135_s6] sm:$0x1]  ;;  %s147_s5 = scalar_lea.vmem [#allocation4], %s146_s19  ;;  %s180_s9 = scalar_lea.hbm %s571_s2, %s510_s4 }
  0x29   : > { %v137_v5 = vmul.f32 11.313708, %v136_v4  ;;  %v142_v6 = vld [vmem:[%s141_s7] sm:$0x1]  ;;  %s153_s11 = scalar_lea.vmem [#allocation4], %s152_s24  ;;  %s184_s0 = sshll.u32 %s180_s9, 4  ;;  %s185_s0 = int_to_ptr.hbm [resolvable:$true] %s184_s0 }
  0x2a   : > { %132 = vst [vmem:[%s524_s29 + $0x1] sm:$0x1] %v131_v3  ;;  %v143_v7 = vmul.f32 11.313708, %v142_v6  ;;  %v148_v8 = vld [vmem:[%s147_s5] sm:$0x1] }
  0x2b   : > { %138 = vst [vmem:[%s524_s29 + $0x2] sm:$0x1] %v137_v5  ;;  %v149_v9 = vmul.f32 11.313708, %v148_v8  ;;  %v154_v10 = vld [vmem:[%s153_s11] sm:$0x1] }
  0x2c   : > { %144 = vst [vmem:[%s524_s29 + $0x3] sm:$0x1] %v143_v7  ;;  %s159_s17 = scalar_lea.vmem [#allocation4], %s158_s26  ;;  %v155_v12 = vmul.f32 11.313708, %v154_v10  ;;  %s165_s19 = scalar_lea.vmem [#allocation4], %s522_s28 }
  0x2d   : > { %v160_v11 = vld [vmem:[%s159_s17] sm:$0x1]  ;;  %150 = vst [vmem:[%s524_s29 + $0x4] sm:$0x1] %v149_v9  ;;  %s170_s4 = scalar_lea.sflag [#allocation6], %s118_s3  ;;  %s372_s20 = sshra.s32 %s185_s0, 4  ;;  %s373_s20 = int_to_ptr.hbm [resolvable:$true] %s372_s20 }
  0x2e   : > { %v161_v13 = vmul.f32 11.313708, %v160_v11  ;;  %156 = vst [vmem:[%s524_s29 + $0x5] sm:$0x1] %v155_v12  ;;  %v166_v14 = vld [vmem:[%s165_s19] sm:$0x1]  ;;  %p379_p2 = scmp.lt.s32.totalorder %s373_s20, %s571_s2 }
  0x2f   : > { %v167_v15 = vmul.f32 11.313708, %v166_v14  ;;  %s374_s24 = scalar_lea.hbm %s373_s20, 8  ;;  %s378_s27 = scalar_lea.hbm %s571_s2, 16 }
  0x30   : > { %162 = vst [vmem:[%s524_s29 + $0x6] sm:$0x1] %v161_v13  ;;  %p375_p13 = scmp.ne.s32.totalorder %s373_s20, %s374_s24  ;;  %p380_p3 = scmp.lt.s32.totalorder %s378_s27, %s374_s24 }
  0x31   : > { %168 = vst [vmem:[%s524_s29 + $0x7] sm:$0x1] %v167_v15 }
  0x32   : > { %p376_p0 = pnand %p375_p13, %p488_p5  ;;  %p381_p4 = por %p380_p3, %p379_p2 }
  0x34   : > { %p377_p1 = pneg %p376_p0 }
  0x36   : > { %p382_p7 = pnand %p381_p4, %p377_p1 }
  0x38   : > { %385 = shalt.err (!%p382_p7)
}
  0x39   : > { %267 = dma.vmem_to_hbm [thread:$0]  (%p488_p5), %s183_s8, 128, %s185_s0, %s170_s4  }
  0x3a PF: > { %p279_p8 = scmp.ge.s32.totalorder %s426_s16, 2  ;;  %s196_s3 = sand.u32 1, %s414_s13  }
  0x3b   : > { %s197_s29 = scalar_lea.sflag [#allocation6], %s196_s3 }
  0x3c   : > { %p274_p9 = pnand %p279_p8, %p492_p6 }
  0x3e   : > { %p275_p10 = pneg %p274_p9 }
  0x40   : > { %409 = dma.done.wait (%p275_p10), %s197_s29, 128  }
  0x41   : > { %411 = vsyncadd (%p275_p10), %s197_s29, 4294967168  ;;  %p21_p11 = scmp.ge.s32.totalorder %s475_s18, 4   ;;  %s574_s13 = smov %s418_s14 }
  0x42   : > { %s575_s14 = smov %s422_s15  ;;  %s576_s15 = smov %s486_s21 }
  0x43   : > { %s577_s16 = smov %s475_s18  ;;  %23 = sbr.rel (!%p21_p11) target bundleno = 10 (0xa), region = 69 }
  0x48   :  { %203 = vsyncpa [#allocation5], 1 }
  0x49   :  { %205 = vsyncpa [#allocation5 + $0x1], 1 }
  0x4a   :  { %206 = vsyncpa [#allocation6], 1 }
  0x4b   :  { %208 = vsyncpa [#allocation6 + $0x1], 1 }

</bundles_post_ra>
